<compile_context>
chip_gen: v5e
topology: v5e:2x2
jax: 0.10.0
libtpu: 0.0.40
codegen_flags: <defaults>
</compile_context>

<pallas_src>
import functools

import jax
import jax.numpy as jnp
from jax import lax
from jax.experimental import pallas as pl
from jax.experimental.pallas import tpu as pltpu


def _round_up(v, m):
    return ((v + m - 1) // m) * m


# ---------------------------------------------------------------------------
# Kernel 1: per-speaker prep (anchor mean + L2 normalization).
#   x_ref : (M, TB, Dp)  utterance-major tile of the padded input
#   posn  : (TB, Dp)     unit-norm positive embedding  (x[:, 0, :])
#   ancn  : (TB, Dp)     unit-norm anchor embedding    (mean of x[:, 1:, :])
# ---------------------------------------------------------------------------
def _prep_kernel(x_ref, posn_ref, ancn_ref):
    m_utt = x_ref.shape[0]

    pos = x_ref[0].astype(jnp.float32)                     # (TB, Dp)
    anc = x_ref[1].astype(jnp.float32)
    for m in range(2, m_utt):                              # static unroll, M small
        anc = anc + x_ref[m].astype(jnp.float32)
    anc = anc * (1.0 / (m_utt - 1))

    # F.cosine_similarity clamps the norm *product* at eps=1e-8; per-vector
    # clamping (sumsq >= 1e-16) is equivalent for non-degenerate inputs and
    # keeps zero-padded rows at exactly 0.
    psq = jnp.sum(pos * pos, axis=-1, keepdims=True)
    asq = jnp.sum(anc * anc, axis=-1, keepdims=True)
    posn = pos * lax.rsqrt(jnp.maximum(psq, 1e-16))
    ancn = anc * lax.rsqrt(jnp.maximum(asq, 1e-16))

    posn_ref[...] = posn.astype(posn_ref.dtype)
    ancn_ref[...] = ancn.astype(ancn_ref.dtype)


# ---------------------------------------------------------------------------
# Kernel 2: scaled cosine-similarity matrix + cross entropy + top-1 accuracy.
# Grid over TB-row tiles of the positives; the full (Npad, Dp) anchor bank
# stays VMEM-resident (index_map -> (0, 0)).  Per-row partial results are
# written lane-dense and reduced (tiny) in plain JAX so the grid axis stays
# "parallel" (megacore / both TCs on v7x).
# ---------------------------------------------------------------------------
def _angproto_kernel(n_true, posn_ref, ancn_ref, wb_ref, loss_ref, corr_ref):
    tb = posn_ref.shape[0]
    npad = ancn_ref.shape[0]

    w = wb_ref[0]
    b = wb_ref[1]
    # NOTE: the reference module's `torch.clamp(self.w, 1e-06)` result is
    # discarded (not in-place), so it has no effect; we match that.

    # cos[i, j] = <unit(pos_i), unit(anc_j)>  -- one MXU matmul, f32 accumulate.
    cos = lax.dot_general(
        posn_ref[...], ancn_ref[...],
        dimension_numbers=(((1,), (1,)), ((), ())),
        preferred_element_type=jnp.float32)                 # (TB, Npad)
    logits = cos * w + b

    row0 = pl.program_id(0) * tb
    col_ids = lax.broadcasted_iota(jnp.int32, (tb, npad), 1)
    row_ids = row0 + lax.broadcasted_iota(jnp.int32, (tb, npad), 0)

    # Label of row i is class i (labels = arange(N)): grab the diagonal via a
    # masked sum (one XLU reduction).
    diag = jnp.sum(jnp.where(col_ids == row_ids, logits, 0.0),
                   axis=-1, keepdims=True)                   # (TB, 1)

    # Mask padded anchor columns out of softmax / argmax.
    logits_m = jnp.where(col_ids < n_true, logits, -jnp.inf)
    row_max = jnp.max(logits_m, axis=-1, keepdims=True)      # (TB, 1)
    lse = row_max + jnp.log(
        jnp.sum(jnp.exp(logits_m - row_max), axis=-1, keepdims=True))

    row_valid = (row0 + lax.broadcasted_iota(jnp.int32, (tb, 1), 0)) < n_true

    per_row_loss = jnp.where(row_valid, lse - diag, 0.0)      # (TB, 1)
    # Top-1 correct iff the diagonal logit equals the row max (reuses the max
    # already computed for the LSE; exact float ties -- measure zero -- count
    # as correct, matching torch.topk up to its unspecified tie ordering).
    per_row_corr = jnp.where(row_valid & (diag >= row_max), 1.0, 0.0)

    loss_ref[...] = jnp.broadcast_to(per_row_loss, loss_ref.shape)
    corr_ref[...] = jnp.broadcast_to(per_row_corr, corr_ref.shape)


def angle_proto(x, w, b, *, row_tile=128, interpret=False):
    """AngleProto forward.

    x: (N, M, D) embeddings, M >= 2 utterances per speaker.
    w, b: learnable scalar scale / offset (module init: 10.0 / -5.0).
    Returns (nloss, prec1): scalar mean cross-entropy over the scaled cosine
    similarity matrix with labels arange(N), and top-1 accuracy (%) as a
    shape-(1,) array -- matching the PyTorch module.
    """
    N, M, D = x.shape
    assert M >= 2, "AngleProto needs at least 2 utterances per speaker"

    dtype = x.dtype
    itemsize = jnp.dtype(dtype).itemsize
    Dp = _round_up(D, 128)                 # lane-dense MXU K dim
    Npad = _round_up(N, 128)               # lane-dense logits columns
    tb = max(8, min(row_tile, Npad))
    tb -= tb % 8
    if Npad % tb:
        tb = 128                           # 128 always divides Npad
    n_tiles = Npad // tb

    # Zero-pad batch / feature dims; transpose to utterance-major so the prep
    # kernel reads clean 2-D (TB, Dp) tiles per utterance (layout plumbing).
    x_p = jnp.pad(x, ((0, Npad - N), (0, 0), (0, Dp - D)))
    x_t = jnp.transpose(x_p, (1, 0, 2))    # (M, Npad, Dp)

    posn, ancn = pl.pallas_call(
        _prep_kernel,
        out_shape=(jax.ShapeDtypeStruct((Npad, Dp), dtype),
                   jax.ShapeDtypeStruct((Npad, Dp), dtype)),
        grid_spec=pltpu.PrefetchScalarGridSpec(
            num_scalar_prefetch=0,
            grid=(n_tiles,),
            in_specs=[pl.BlockSpec((M, tb, Dp), lambda i: (0, i, 0))],
            out_specs=(pl.BlockSpec((tb, Dp), lambda i: (i, 0)),
                       pl.BlockSpec((tb, Dp), lambda i: (i, 0)))),
        compiler_params=pltpu.CompilerParams(
            dimension_semantics=("parallel",)),
        cost_estimate=pl.CostEstimate(
            flops=6 * Npad * M * Dp,
            transcendentals=2 * Npad,
            bytes_accessed=(M + 2) * Npad * Dp * itemsize),
        interpret=interpret,
    )(x_t)

    wb = jnp.stack([jnp.asarray(w, jnp.float32),
                    jnp.asarray(b, jnp.float32)])             # (2,) -> SMEM

    # VMEM budget: resident anchor bank + double-buffered positive tile +
    # (TB, Npad) logits working set + lane-dense outputs; kept well under the
    # v7x 32 MiB scoped default.
    vmem_bytes = (2 * Npad * Dp * itemsize
                  + 2 * tb * Dp * itemsize
                  + 2 * tb * Npad * 4
                  + 4 * tb * 128 * 4)
    vmem_limit = int(min(max(4 * vmem_bytes, 16 * 1024 * 1024),
                         32 * 1024 * 1024))
    # NOTE: for very large N*D the resident anchors / (TB, Npad) logits tile
    # would need a column grid with an online (flash-style) LSE accumulator.

    loss_rows, corr_rows = pl.pallas_call(
        functools.partial(_angproto_kernel, N),
        out_shape=(jax.ShapeDtypeStruct((Npad, 128), jnp.float32),
                   jax.ShapeDtypeStruct((Npad, 128), jnp.float32)),
        grid_spec=pltpu.PrefetchScalarGridSpec(
            num_scalar_prefetch=0,
            grid=(n_tiles,),
            in_specs=[pl.BlockSpec((tb, Dp), lambda i: (i, 0)),
                      pl.BlockSpec((Npad, Dp), lambda i: (0, 0)),
                      pl.BlockSpec(memory_space=pltpu.MemorySpace.SMEM)],
            out_specs=(pl.BlockSpec((tb, 128), lambda i: (i, 0)),
                       pl.BlockSpec((tb, 128), lambda i: (i, 0)))),
        compiler_params=pltpu.CompilerParams(
            dimension_semantics=("parallel",),
            vmem_limit_bytes=vmem_limit),
        cost_estimate=pl.CostEstimate(
            flops=2 * Npad * Npad * Dp + 10 * Npad * Npad,
            transcendentals=Npad * Npad,
            bytes_accessed=((n_tiles + 1) * Npad * Dp * itemsize
                            + 2 * Npad * 128 * 4)),
        interpret=interpret,
    )(posn, ancn, wb)

    nloss = jnp.sum(loss_rows[:, 0]) / N
    prec1 = (jnp.sum(corr_rows[:, 0]) * (100.0 / N)).reshape(1)
    return nloss, prec1


if __name__ == "__main__":
    key = jax.random.PRNGKey(0)
    N, M, D = 8, 3, 64
    x = jax.random.normal(key, (N, M, D), jnp.float32)
    init_w, init_b = 10.0, -5.0

    nloss, prec1 = angle_proto(x, jnp.float32(init_w), jnp.float32(init_b))
    jax.block_until_ready((nloss, prec1))

    # plain-JAX reference (mirrors the PyTorch forward)
    out_anchor = jnp.mean(x[:, 1:, :], axis=1)
    out_positive = x[:, 0, :]
    pn = jnp.linalg.norm(out_positive, axis=-1, keepdims=True)   # (N, 1)
    an = jnp.linalg.norm(out_anchor, axis=-1, keepdims=True)     # (N, 1)
    cos = (out_positive @ out_anchor.T) / jnp.maximum(pn * an.T, 1e-8)
    logits = cos * init_w + init_b
    labels = jnp.arange(N)
    lse = jax.nn.logsumexp(logits, axis=-1)
    ref_loss = jnp.mean(lse - jnp.diagonal(logits))
    ref_prec = 100.0 * jnp.mean(
        (jnp.argmax(logits, axis=-1) == labels).astype(jnp.float32))

    assert jnp.allclose(nloss, ref_loss, rtol=1e-4, atol=1e-4), (nloss, ref_loss)
    assert jnp.allclose(prec1[0], ref_prec, rtol=1e-4, atol=1e-4), (prec1, ref_prec)

    print("KERNEL_OK")
</pallas_src>

<mosaic_0001>
module attributes {stable_mosaic.version = 11 : i64} {
  func.func @_prep_kernel(%arg0: i32, %arg1: memref<3x128x128xf32, #tpu.memory_space<vmem>>, %arg2: memref<128x128xf32, #tpu.memory_space<vmem>>, %arg3: memref<128x128xf32, #tpu.memory_space<vmem>>) attributes {dimension_semantics = [#tpu.dimension_semantics<parallel>], iteration_bounds = array<i64: 1>, scalar_prefetch = 0 : i64, scratch_operands = 0 : i64, tpu.core_type = #tpu.core_type<tc>, window_params = [{transform_indices = @transform_0, window_bounds = array<i64: 3, 128, 128>}, {transform_indices = @transform_1, window_bounds = array<i64: 128, 128>}, {transform_indices = @transform_2, window_bounds = array<i64: 128, 128>}]} {
    %c0 = arith.constant 0 : index
    %c0_0 = arith.constant 0 : index
    %c0_1 = arith.constant 0 : index
    %0 = vector.load %arg1[%c0, %c0_0, %c0_1] : memref<3x128x128xf32, #tpu.memory_space<vmem>>, vector<1x128x128xf32>
    %1 = vector.shape_cast %0 : vector<1x128x128xf32> to vector<128x128xf32>
    %c1 = arith.constant 1 : index
    %c0_2 = arith.constant 0 : index
    %c0_3 = arith.constant 0 : index
    %2 = vector.load %arg1[%c1, %c0_2, %c0_3] : memref<3x128x128xf32, #tpu.memory_space<vmem>>, vector<1x128x128xf32>
    %3 = vector.shape_cast %2 : vector<1x128x128xf32> to vector<128x128xf32>
    %c2 = arith.constant 2 : index
    %c0_4 = arith.constant 0 : index
    %c0_5 = arith.constant 0 : index
    %4 = vector.load %arg1[%c2, %c0_4, %c0_5] : memref<3x128x128xf32, #tpu.memory_space<vmem>>, vector<1x128x128xf32>
    %5 = vector.shape_cast %4 : vector<1x128x128xf32> to vector<128x128xf32>
    %6 = arith.addf %3, %5 : vector<128x128xf32>
    %cst = arith.constant 5.000000e-01 : f32
    %7 = vector.broadcast %cst : f32 to vector<128x128xf32>
    %8 = arith.mulf %6, %7 : vector<128x128xf32>
    %9 = arith.mulf %1, %1 : vector<128x128xf32>
    %cst_6 = arith.constant dense<0.000000e+00> : vector<128xf32>
    %10 = vector.multi_reduction <add>, %9, %cst_6 [1] : vector<128x128xf32> to vector<128xf32>
    %11 = vector.shape_cast %10 : vector<128xf32> to vector<128x1xf32>
    %12 = arith.mulf %8, %8 : vector<128x128xf32>
    %cst_7 = arith.constant dense<0.000000e+00> : vector<128xf32>
    %13 = vector.multi_reduction <add>, %12, %cst_7 [1] : vector<128x128xf32> to vector<128xf32>
    %14 = vector.shape_cast %13 : vector<128xf32> to vector<128x1xf32>
    %cst_8 = arith.constant 1.000000e-16 : f32
    %15 = vector.broadcast %cst_8 : f32 to vector<128x1xf32>
    %16 = arith.maximumf %11, %15 : vector<128x1xf32>
    %17 = math.rsqrt %16 : vector<128x1xf32>
    %18 = vector.broadcast %17 : vector<128x1xf32> to vector<128x128xf32>
    %19 = arith.mulf %1, %18 : vector<128x128xf32>
    %cst_9 = arith.constant 1.000000e-16 : f32
    %20 = vector.broadcast %cst_9 : f32 to vector<128x1xf32>
    %21 = arith.maximumf %14, %20 : vector<128x1xf32>
    %22 = math.rsqrt %21 : vector<128x1xf32>
    %23 = vector.broadcast %22 : vector<128x1xf32> to vector<128x128xf32>
    %24 = arith.mulf %8, %23 : vector<128x128xf32>
    %c0_10 = arith.constant 0 : index
    %c0_11 = arith.constant 0 : index
    %25 = vector.load %arg2[%c0_10, %c0_11] : memref<128x128xf32, #tpu.memory_space<vmem>>, vector<128x128xf32>
    tpu.vector_store %arg2[%c0_10, %c0_11], %19 {strides = array<i32>} : memref<128x128xf32, #tpu.memory_space<vmem>>, vector<128x128xf32>,
    %c0_12 = arith.constant 0 : index
    %c0_13 = arith.constant 0 : index
    %26 = vector.load %arg3[%c0_12, %c0_13] : memref<128x128xf32, #tpu.memory_space<vmem>>, vector<128x128xf32>
    tpu.vector_store %arg3[%c0_12, %c0_13], %24 {strides = array<i32>} : memref<128x128xf32, #tpu.memory_space<vmem>>, vector<128x128xf32>,
    return
  }
  func.func @transform_0(%arg0: i32) -> (i32, i32, i32) {
    %c0_i32 = arith.constant 0 : i32
    %c0_i32_0 = arith.constant 0 : i32
    %c0_i32_1 = arith.constant 0 : i32
    return %c0_i32, %arg0, %c0_i32_0 : i32, i32, i32
  }
  func.func @transform_1(%arg0: i32) -> (i32, i32) {
    %c0_i32 = arith.constant 0 : i32
    %c0_i32_0 = arith.constant 0 : i32
    return %arg0, %c0_i32 : i32, i32
  }
  func.func @transform_2(%arg0: i32) -> (i32, i32) {
    %c0_i32 = arith.constant 0 : i32
    %c0_i32_0 = arith.constant 0 : i32
    return %arg0, %c0_i32 : i32, i32
  }
}

</mosaic_0001>

<bundles_post_ra>
// kernel: tpu_custom_call.1
= control target key start
LH: loop header
LB: loop body
LE: loop exit
PB: predicated region body
PF: predicated region fallthrough
CT: control target
= control target key end

     0   :  { %8 = vsyncpa [#allocation3], 0  ;;  %s1351_s0 = inlined_call_operand.hbm [shape: f32[3,128,128], index: 0, kind: input, shape index: {}]   ;;  %s1352_s1 = inlined_call_operand.hbm [shape: f32[128,128], index: 1, kind: output, shape index: {0}]   ;;  %s1353_s2 = inlined_call_operand.hbm [shape: f32[128,128], index: 2, kind: output, shape index: {1}]  }
   0x1   :  { %9 = vsyncpa [#allocation4], 0 }
   0x2   :  { %10 = vsyncpa [#allocation7], 0  ;;  %s15_s11 = sshll.u32 %s1351_s0, 4  ;;  %s806_s12 = smov [#allocation2]   ;;  %s16_s11 = int_to_ptr.hbm [resolvable:$true] %s15_s11 }
   0x3   :  { %s17_s13 = sshll.u32 %s806_s12, 4  ;;  %s807_s14 = smov 128   ;;  %s18_s13 = int_to_ptr.vmem [resolvable:$true] %s17_s13 }
   0x4   :  { %s808_s15 = smov 8  }
   0x5   :  { %23 = dma.hbm_to_vmem [thread:$0]  %s16_s11, 6144, %s18_s13, [#allocation3], %s807_s14, %s807_s14, %s808_s15  }
   0x6   :  { %800 = dma.done.wait [#allocation3], 6144  }
   0x7   :  { %801 = vsyncadd [#allocation3], 4294961152  ;;  %v832_v0 = vld [vmem:[#allocation2 + $0x20] sm:$0xff]  ;;  %v834_v1 = vld [vmem:[#allocation2 + $0x10] sm:$0xff]  ;;  %s809_s0 = smov [#allocation5]   ;;  %s628_s19 = sshll.u32 %s1352_s1, 4  ;;  %s629_s19 = int_to_ptr.hbm [resolvable:$true] %s628_s19 }
   0x8   :  { %v836_v2 = vld [vmem:[#allocation2] sm:$0xff]  ;;  %v114_v3 = vmul.f32 %v832_v0, %v832_v0  ;;  %v112_v4 = vmul.f32 %v834_v1, %v834_v1  ;;  %v844_v6 = vld [vmem:[#allocation2 + $0x28] sm:$0xff]  ;;  %v846_v7 = vld [vmem:[#allocation2 + $0x18] sm:$0xff]  ;;  %s1231_s16 = sshll.u32 %s809_s0, 4  ;;  %s810_s1 = smov [#allocation6]   ;;  %s627_s16 = int_to_ptr.vmem [resolvable:$true] %s1231_s16 }
   0x9   :  { %v110_v5 = vmul.f32 %v836_v2, %v836_v2  ;;  %v848_v8 = vld [vmem:[#allocation2 + $0x8] sm:$0xff]  ;;  %v115_v9 = vmul.f32 %v844_v6, %v844_v6  ;;  %v113_v10 = vmul.f32 %v846_v7, %v846_v7  ;;  %v856_v12 = vld [vmem:[#allocation2 + $0x40] sm:$0xff]  ;;  %v858_v13 = vld [vmem:[#allocation2 + $0x38] sm:$0xff]  ;;  %s639_s20 = sshll.u32 %s810_s1, 4  ;;  %s641_s23 = sshll.u32 %s1353_s2, 4  ;;  %s640_s20 = int_to_ptr.vmem [resolvable:$true] %s639_s20  ;;  %s642_s23 = int_to_ptr.hbm [resolvable:$true] %s641_s23 }
   0xa   :  { %134 = vadd.xlane.f32.xlu2 %v114_v3  ;;  %130 = vadd.xlane.f32.xlu1 %v112_v4  ;;  %v111_v11 = vmul.f32 %v848_v8, %v848_v8  ;;  %v860_v14 = vld [vmem:[#allocation2 + $0x30] sm:$0xff]  ;;  %v118_v15 = vmul.f32 %v856_v12, %v856_v12  ;;  %v117_v16 = vmul.f32 %v858_v13, %v858_v13  ;;  %v868_v18 = vld [vmem:[#allocation2 + $0x58] sm:$0xff]  ;;  %v872_v20 = vld [vmem:[#allocation2 + $0x48] sm:$0xff] }
   0xb   :  { %126 = vadd.xlane.f32.xlu0 %v110_v5  ;;  %v116_v17 = vmul.f32 %v860_v14, %v860_v14  ;;  %v870_v19 = vld [vmem:[#allocation2 + $0x50] sm:$0xff]  ;;  %v121_v21 = vmul.f32 %v868_v18, %v868_v18  ;;  %v119_v23 = vmul.f32 %v872_v20, %v872_v20  ;;  %v882_v25 = vld [vmem:[#allocation2 + $0x68] sm:$0xff]  ;;  %v45_v28 = vld [vmem:[#allocation2 + $0x80] sm:$0xff] }
   0xc   :  { %v120_v22 = vmul.f32 %v870_v19, %v870_v19  ;;  %v880_v24 = vld [vmem:[#allocation2 + $0x70] sm:$0xff]  ;;  %v46_v26 = vld [vmem:[#allocation2 + $0x88] sm:$0xff]  ;;  %v62_v29 = vld [vmem:[#allocation2 + $0x100] sm:$0xff]  ;;  %v123_v32 = vmul.f32 %v882_v25, %v882_v25 }
   0xd   :  { %v63_v27 = vld [vmem:[#allocation2 + $0x108] sm:$0xff]  ;;  %v884_v30 = vld [vmem:[#allocation2 + $0x60] sm:$0xff]  ;;  %v124_v31 = vmul.f32 %v880_v24, %v880_v24  ;;  %v78_v34 = vadd.f32 %v62_v29, %v45_v28  ;;  %v48_v40 = vld [vmem:[#allocation2 + $0x98] sm:$0xff] }
   0xe   :  { %v79_v33 = vadd.f32 %v63_v27, %v46_v26  ;;  %v122_v35 = vmul.f32 %v884_v30, %v884_v30  ;;  %v49_v38 = vld [vmem:[#allocation2 + $0xa0] sm:$0xff]  ;;  %v65_v41 = vld [vmem:[#allocation2 + $0x118] sm:$0xff]  ;;  %v47_v43 = vld [vmem:[#allocation2 + $0x90] sm:$0xff] }
   0xf   :  { %v894_v37 = vmul.f32 0.5, %v78_v34  ;;  %v66_v39 = vld [vmem:[#allocation2 + $0x120] sm:$0xff]  ;;  %v896_v42 = vld [vmem:[#allocation2 + $0x78] sm:$0xff]  ;;  %v64_v44 = vld [vmem:[#allocation2 + $0x110] sm:$0xff]  ;;  %v81_v48 = vadd.f32 %v65_v41, %v48_v40 }
  0x10   :  { %v892_v36 = vmul.f32 0.5, %v79_v33  ;;  %v82_v47 = vadd.f32 %v66_v39, %v49_v38  ;;  %v125_v49 = vmul.f32 %v896_v42, %v896_v42  ;;  %v80_v50 = vadd.f32 %v64_v44, %v47_v43  ;;  %v52_v53 = vld [vmem:[#allocation2 + $0xb8] sm:$0xff]  ;;  %v51_v56 = vld [vmem:[#allocation2 + $0xb0] sm:$0xff]  ;;  %v50_v58 = vld [vmem:[#allocation2 + $0xa8] sm:$0xff] }
  0x11   :  { %v158_v46 = vmul.f32 %v894_v37, %v894_v37  ;;  %v906_v52 = vmul.f32 0.5, %v81_v48  ;;  %v69_v55 = vld [vmem:[#allocation2 + $0x138] sm:$0xff]  ;;  %v68_v57 = vld [vmem:[#allocation2 + $0x130] sm:$0xff]  ;;  %v67_v59 = vld [vmem:[#allocation2 + $0x128] sm:$0xff] }
  0x12   :  { %136 = vadd.xlane.f32.xlu2 %v115_v9  ;;  %132 = vadd.xlane.f32.xlu1 %v113_v10  ;;  %v159_v45 = vmul.f32 %v892_v36, %v892_v36  ;;  %v904_v51 = vmul.f32 0.5, %v82_v47  ;;  %v908_v54 = vmul.f32 0.5, %v80_v50  ;;  %v85_v62 = vadd.f32 %v69_v55, %v52_v53  ;;  %v55_v10 = vld [vmem:[#allocation2 + $0xd0] sm:$0xff]  ;;  %v58_v34 = vld [vmem:[#allocation2 + $0xe8] sm:$0xff]  ;;  %v57_v39 = vld [vmem:[#allocation2 + $0xe0] sm:$0xff] }
  0x13   :  { %128 = vadd.xlane.f32.xlu0 %v111_v11  ;;  %v161_v61 = vmul.f32 %v906_v52, %v906_v52  ;;  %v84_v63 = vadd.f32 %v68_v57, %v51_v56  ;;  %v83_v4 = vadd.f32 %v67_v59, %v50_v58  ;;  %v75_v38 = vld [vmem:[#allocation2 + $0x168] sm:$0xff]  ;;  %v74_v40 = vld [vmem:[#allocation2 + $0x160] sm:$0xff]  ;;  %v56_v41 = vld [vmem:[#allocation2 + $0xd8] sm:$0xff] }
  0x14   :  { %v162_v60 = vmul.f32 %v904_v51, %v904_v51  ;;  %v160_v3 = vmul.f32 %v908_v54, %v908_v54  ;;  %v916_v5 = vmul.f32 0.5, %v85_v62  ;;  %v73_v43 = vld [vmem:[#allocation2 + $0x158] sm:$0xff]  ;;  %v90_v47 = vadd.f32 %v74_v40, %v57_v39  ;;  %v59_v58 = vld [vmem:[#allocation2 + $0xf0] sm:$0xff] }
  0x15   :  { %v918_v9 = vmul.f32 0.5, %v84_v63  ;;  %v920_v11 = vmul.f32 0.5, %v83_v4  ;;  %v60_v56 = vld [vmem:[#allocation2 + $0xf8] sm:$0xff]  ;;  %v76_v59 = vld [vmem:[#allocation2 + $0x170] sm:$0xff] }
  0x16   :  { %v942_v53 = vmul.f32 0.5, %v90_v47  ;;  %v77_v57 = vld [vmem:[#allocation2 + $0x178] sm:$0xff] }
  0x17   :  { %v164_v26 = vmul.f32 %v918_v9, %v918_v9  ;;  %v163_v29 = vmul.f32 %v920_v11, %v920_v11  ;;  %v93_v62 = vadd.f32 %v77_v57, %v60_v56 }
  0x19   :  { %v952_v4 = vmul.f32 0.5, %v93_v62 }
  0x1a   :  { %142 = vadd.xlane.f32.xlu2 %v118_v15  ;;  %140 = vadd.xlane.f32.xlu1 %v117_v16  ;;  %v72_v15 = vld [vmem:[#allocation2 + $0x150] sm:$0xff]  ;;  %v54_v16 = vld [vmem:[#allocation2 + $0xc8] sm:$0xff] }
  0x1b   :  { %138 = vadd.xlane.f32.xlu0 %v116_v17  ;;  %v71_v17 = vld [vmem:[#allocation2 + $0x148] sm:$0xff]  ;;  %v88_v27 = vadd.f32 %v72_v15, %v55_v10  ;;  %v173_v15 = vmul.f32 %v952_v4, %v952_v4 }
  0x1c   :  { %v87_v28 = vadd.f32 %v71_v17, %v54_v16 }
  0x1e   :  { %v930_v33 = vmul.f32 0.5, %v87_v28 }
  0x22   :  { %148 = vadd.xlane.f32.xlu2 %v121_v21  ;;  %146 = vadd.xlane.f32.xlu1 %v120_v22  ;;  %v53_v21 = vld [vmem:[#allocation2 + $0xc0] sm:$0xff] }
  0x23   :  { %144 = vadd.xlane.f32.xlu0 %v119_v23  ;;  %v70_v22 = vld [vmem:[#allocation2 + $0x140] sm:$0xff]  ;;  %v165_v23 = vmul.f32 %v916_v5, %v916_v5 }
  0x2a   :  { %154 = vadd.xlane.f32.xlu2 %v124_v31  ;;  %152 = vadd.xlane.f32.xlu1 %v123_v32  ;;  %v86_v31 = vadd.f32 %v70_v22, %v53_v21  ;;  %v928_v32 = vmul.f32 0.5, %v88_v27 }
  0x2b   :  { %150 = vadd.xlane.f32.xlu0 %v122_v35 }
  0x2c   :  { %v932_v35 = vmul.f32 0.5, %v86_v31  ;;  %v168_v44 = vmul.f32 %v928_v32, %v928_v32 }
  0x2e   :  { %v166_v48 = vmul.f32 %v932_v35, %v932_v35 }
  0x32   :  { %176 = vadd.xlane.f32.xlu2 %v159_v45  ;;  %174 = vadd.xlane.f32.xlu1 %v158_v46  ;;  %v167_v45 = vmul.f32 %v930_v33, %v930_v33  ;;  %v91_v46 = vadd.f32 %v75_v38, %v58_v34 }
  0x33   :  { %156 = vadd.xlane.f32.xlu0 %v125_v49  ;;  %v89_v49 = vadd.f32 %v73_v43, %v56_v41 }
  0x34   :  { %v940_v50 = vmul.f32 0.5, %v91_v46 }
  0x35   :  { %v944_v55 = vmul.f32 0.5, %v89_v49 }
  0x37   :  { %v169_v63 = vmul.f32 %v944_v55, %v944_v55 }
  0x3a   :  { %182 = vadd.xlane.f32.xlu2 %v162_v60  ;;  %180 = vadd.xlane.f32.xlu1 %v161_v61  ;;  %v171_v60 = vmul.f32 %v940_v50, %v940_v50  ;;  %v170_v61 = vmul.f32 %v942_v53, %v942_v53 }
  0x3b   :  { %178 = vadd.xlane.f32.xlu0 %v160_v3  ;;  %v92_v3 = vadd.f32 %v76_v59, %v59_v58 }
  0x3d   :  { %v954_v10 = vmul.f32 0.5, %v92_v3 }
  0x3f   :  { %v172_v16 = vmul.f32 %v954_v10, %v954_v10 }
  0x42   :  { %188 = vadd.xlane.f32.xlu2 %v165_v23  ;;  %186 = vadd.xlane.f32.xlu1 %v164_v26 }
  0x43   :  { %184 = vadd.xlane.f32.xlu0 %v163_v29 }
  0x4a   :  { %194 = vadd.xlane.f32.xlu2 %v168_v44  ;;  %192 = vadd.xlane.f32.xlu1 %v167_v45 }
  0x4b   :  { %190 = vadd.xlane.f32.xlu0 %v166_v48 }
  0x52   :  { %200 = vadd.xlane.f32.xlu2 %v171_v60  ;;  %198 = vadd.xlane.f32.xlu1 %v170_v61 }
  0x53   :  { %196 = vadd.xlane.f32.xlu0 %v169_v63 }
  0x5a   :  { %204 = vadd.xlane.f32.xlu1 %v173_v15 }
  0x5b   :  { %202 = vadd.xlane.f32.xlu0 %v172_v16 }
  0x7d   :  { %v135_v17 = vpop.xlane.xlu2 %134  ;;  %v131_v21 = vpop.xlane.xlu1 %130 }
  0x7e   :  { %v210_v22 = vmax.f32 %v135_v17, 1e-16  ;;  %v208_v23 = vmax.f32 %v131_v21, 1e-16  ;;  %v127_v26 = vpop.xlane.xlu0 %126 }
  0x7f   :  { %v206_v27 = vmax.f32 %v127_v26, 1e-16 }
  0x80   :  { %664 = vrsqrt.f32 %v210_v22  ;;  %vm268_vm0 = vweird.f32 %v210_v22  ;;  %vm248_vm2 = vweird.f32 %v208_v23 }
  0x81   :  { %666 = vrsqrt.f32 %v208_v23  ;;  %vm228_vm4 = vweird.f32 %v206_v27 }
  0x82   :  { %668 = vrsqrt.f32 %v206_v27 }
  0x85   :  { %v137_v28 = vpop.xlane.xlu2 %136  ;;  %v133_v29 = vpop.xlane.xlu1 %132 }
  0x86   :  { %v665_v31 = vpop.eup %664  ;;  %v960_v34 = vmax.f32 %v137_v28, 1e-16  ;;  %v962_v38 = vmax.f32 %v133_v29, 1e-16  ;;  %v129_v39 = vpop.xlane.xlu0 %128 }
  0x87   :  { %v667_v40 = vpop.eup %666  ;;  %v263_v41 = vmul.f32 %v665_v31, %v210_v22  ;;  %v964_v43 = vmax.f32 %v129_v39, 1e-16  ;;  %vm269_vm1 = vweird.f32 %v665_v31 }
  0x88   :  { %v669_v44 = vpop.eup %668  ;;  %v243_v45 = vmul.f32 %v667_v40, %v208_v23  ;;  %670 = vrsqrt.f32 %v960_v34  ;;  %vm249_vm3 = vweird.f32 %v667_v40  ;;  %vm270_vm6 = vmor %vm268_vm0, %vm269_vm1  ;;  %vm278_vm9 = vweird.f32 %v960_v34 }
  0x89   :  { %v264_v46 = vmul.f32 %v665_v31, %v263_v41  ;;  %v223_v47 = vmul.f32 %v669_v44, %v206_v27  ;;  %672 = vrsqrt.f32 %v962_v38  ;;  %vm229_vm5 = vweird.f32 %v669_v44  ;;  %vm250_vm7 = vmor %vm248_vm2, %vm249_vm3 }
  0x8a   :  { %v244_v48 = vmul.f32 %v667_v40, %v243_v45  ;;  %674 = vrsqrt.f32 %v964_v43  ;;  %vm230_vm8 = vmor %vm228_vm4, %vm229_vm5  ;;  %vm258_vm14 = vweird.f32 %v962_v38  ;;  %vm238_vm15 = vweird.f32 %v964_v43 }
  0x8b   :  { %v265_v49 = vmul.f32 0.5, %v264_v46  ;;  %v224_v56 = vmul.f32 %v669_v44, %v223_v47 }
  0x8c   :  { %v245_v57 = vmul.f32 0.5, %v244_v48 }
  0x8d   :  { %v266_v58 = vsub.f32 1.5, %v265_v49  ;;  %v225_v59 = vmul.f32 0.5, %v224_v56  ;;  %v143_v60 = vpop.xlane.xlu2 %142  ;;  %v141_v61 = vpop.xlane.xlu1 %140 }
  0x8e   :  { %v969_v62 = vpop.eup %670  ;;  %v246_v63 = vsub.f32 1.5, %v245_v57  ;;  %v971_v3 = vmax.f32 %v143_v60, 1e-16  ;;  %v139_v15 = vpop.xlane.xlu0 %138  ;;  %v984_v41 = vmax.f32 %v141_v61, 1e-16 }
  0x8f   :  { %v973_v16 = vpop.eup %672  ;;  %v267_v17 = vmul.f32 %v665_v31, %v266_v58  ;;  %v226_v21 = vsub.f32 1.5, %v225_v59  ;;  %v273_v26 = vmul.f32 %v969_v62, %v960_v34  ;;  %vm279_vm10 = vweird.f32 %v969_v62 }
  0x90   :  { %v977_v28 = vpop.eup %674  ;;  %v247_v29 = vmul.f32 %v667_v40, %v246_v63  ;;  %v253_v39 = vmul.f32 %v973_v16, %v962_v38  ;;  %676 = vrsqrt.f32 %v971_v3  ;;  %vm259_vm11 = vweird.f32 %v973_v16  ;;  %vm280_vm13 = vmor %vm278_vm9, %vm279_vm10 }
  0x91   :  { %v271_v45 = vsel %vm270_vm6, %v665_v31, %v267_v17  ;;  %v227_v46 = vmul.f32 %v669_v44, %v226_v21  ;;  %v274_v47 = vmul.f32 %v969_v62, %v273_v26  ;;  %v233_v48 = vmul.f32 %v977_v28, %v964_v43  ;;  %vm260_vm0 = vmor %vm258_vm14, %vm259_vm11 }
  0x92   :  { %v386_v22 = vmul.f32 %v271_v45, %v832_v0  ;;  %v251_v49 = vsel %vm250_vm7, %v667_v40, %v247_v29  ;;  %v254_v56 = vmul.f32 %v973_v16, %v253_v39  ;;  %678 = vrsqrt.f32 %v984_v41 }
  0x93   :  { %v384_v57 = vmul.f32 %v251_v49, %v834_v1  ;;  %v231_v31 = vsel %vm230_vm8, %v669_v44, %v227_v46  ;;  %v275_v58 = vmul.f32 0.5, %v274_v47  ;;  %v234_v23 = vmul.f32 %v977_v28, %v233_v48 }
  0x94   :  { %594 = vst [vmem:[#allocation5 + $0x20] sm:$0xff] %v386_v22  ;;  %v382_v59 = vmul.f32 %v231_v31, %v836_v2  ;;  %v255_v60 = vmul.f32 0.5, %v254_v56  ;;  %v1001_v40 = vmax.f32 %v139_v15, 1e-16  ;;  %vm239_vm12 = vweird.f32 %v977_v28 }
  0x95   :  { %592 = vst [vmem:[#allocation5 + $0x10] sm:$0xff] %v384_v57  ;;  %v276_v0 = vsub.f32 1.5, %v275_v58  ;;  %v235_v27 = vmul.f32 0.5, %v234_v23  ;;  %v149_v1 = vpop.xlane.xlu2 %148  ;;  %v147_v44 = vpop.xlane.xlu1 %146  ;;  %vm240_vm1 = vmor %vm238_vm15, %vm239_vm12  ;;  %vm308_vm2 = vweird.f32 %v971_v3  ;;  %vm298_vm5 = vweird.f32 %v984_v41 }
  0x96   :  { %v677_v61 = vpop.eup %676  ;;  %590 = vst [vmem:[#allocation5] sm:$0xff] %v382_v59  ;;  %v256_v63 = vsub.f32 1.5, %v255_v60  ;;  %v1004_v2 = vmax.f32 %v149_v1, 1e-16  ;;  %v1006_v17 = vmax.f32 %v147_v44, 1e-16  ;;  %v145_v21 = vpop.xlane.xlu0 %144  ;;  %680 = vrsqrt.f32 %v1001_v40 }
  0x97   :  { %v277_v26 = vmul.f32 %v969_v62, %v276_v0  ;;  %v236_v29 = vsub.f32 1.5, %v235_v27  ;;  %v303_v15 = vmul.f32 %v677_v61, %v971_v3  ;;  %v1031_v57 = vmax.f32 %v145_v21, 1e-16 }
  0x98   :  { %v257_v39 = vmul.f32 %v973_v16, %v256_v63  ;;  %682 = vrsqrt.f32 %v1004_v2  ;;  %v679_v48 = vpop.eup %678  ;;  %vm309_vm3 = vweird.f32 %v677_v61  ;;  %vm288_vm7 = vweird.f32 %v1001_v40 }
  0x99   :  { %v281_v45 = vsel %vm280_vm13, %v969_v62, %v277_v26  ;;  %v237_v46 = vmul.f32 %v977_v28, %v236_v29  ;;  %v304_v47 = vmul.f32 %v677_v61, %v303_v15  ;;  %684 = vrsqrt.f32 %v1006_v17  ;;  %vm310_vm4 = vmor %vm308_vm2, %vm309_vm3 }
  0x9a   :  { %v387_v34 = vmul.f32 %v281_v45, %v844_v6  ;;  %v261_v22 = vsel %vm260_vm0, %v973_v16, %v257_v39  ;;  %v293_v49 = vmul.f32 %v679_v48, %v984_v41  ;;  %686 = vrsqrt.f32 %v1031_v57 }
  0x9b   :  { %v385_v38 = vmul.f32 %v261_v22, %v846_v7  ;;  %v241_v43 = vsel %vm240_vm1, %v977_v28, %v237_v46  ;;  %v305_v62 = vmul.f32 0.5, %v304_v47  ;;  %vm299_vm6 = vweird.f32 %v679_v48 }
  0x9c   :  { %595 = vst [vmem:[#allocation5 + $0x28] sm:$0xff] %v387_v34  ;;  %v383_v56 = vmul.f32 %v241_v43, %v848_v8  ;;  %v294_v16 = vmul.f32 %v679_v48, %v293_v49  ;;  %v1034_v23 = vpop.eup %680  ;;  %vm338_vm8 = vweird.f32 %v1004_v2  ;;  %vm300_vm9 = vmor %vm298_vm5, %vm299_vm6  ;;  %vm328_vm14 = vweird.f32 %v1006_v17 }
  0x9d   :  { %593 = vst [vmem:[#allocation5 + $0x18] sm:$0xff] %v385_v38  ;;  %v306_v6 = vsub.f32 1.5, %v305_v62  ;;  %v155_v31 = vpop.xlane.xlu2 %154  ;;  %v153_v58 = vpop.xlane.xlu1 %152  ;;  %v283_v27 = vmul.f32 %v1034_v23, %v1001_v40  ;;  %vm289_vm10 = vweird.f32 %v1034_v23  ;;  %vm318_vm15 = vweird.f32 %v1031_v57 }
  0x9e   :  { %591 = vst [vmem:[#allocation5 + $0x8] sm:$0xff] %v383_v56  ;;  %v1037_v7 = vmax.f32 %v155_v31, 1e-16  ;;  %v1039_v28 = vmax.f32 %v153_v58, 1e-16  ;;  %v151_v8 = vpop.xlane.xlu0 %150  ;;  %v1041_v59 = vpop.eup %682  ;;  %v295_v0 = vmul.f32 0.5, %v294_v16  ;;  %vm290_vm13 = vmor %vm288_vm7, %vm289_vm10 }
  0x9f   :  { %v307_v60 = vmul.f32 %v677_v61, %v306_v6  ;;  %v1045_v1 = vpop.eup %684  ;;  %v333_v44 = vmul.f32 %v1041_v59, %v1004_v2  ;;  %v284_v26 = vmul.f32 %v1034_v23, %v283_v27  ;;  %vm339_vm11 = vweird.f32 %v1041_v59 }
  0xa0   :  { %688 = vrsqrt.f32 %v1037_v7  ;;  %v296_v21 = vsub.f32 1.5, %v295_v0  ;;  %v323_v29 = vmul.f32 %v1045_v1, %v1006_v17  ;;  %v1063_v46 = vpop.eup %686  ;;  %v1070_v47 = vmax.f32 %v151_v8, 1e-16  ;;  %vm340_vm0 = vmor %vm338_vm8, %vm339_vm11 }
  0xa1   :  { %v311_v63 = vsel %vm310_vm4, %v677_v61, %v307_v60  ;;  %v334_v3 = vmul.f32 %v1041_v59, %v333_v44  ;;  %690 = vrsqrt.f32 %v1039_v28  ;;  %v285_v45 = vmul.f32 0.5, %v284_v26 }
  0xa2   :  { %v390_v15 = vmul.f32 %v311_v63, %v856_v12  ;;  %v297_v39 = vmul.f32 %v679_v48, %v296_v21  ;;  %v324_v61 = vmul.f32 %v1045_v1, %v323_v29  ;;  %v313_v43 = vmul.f32 %v1063_v46, %v1031_v57 }
  0xa3   :  { %v335_v12 = vmul.f32 0.5, %v334_v3  ;;  %v286_v22 = vsub.f32 1.5, %v285_v45  ;;  %vm329_vm12 = vweird.f32 %v1045_v1  ;;  %692 = vrsqrt.f32 %v1070_v47 }
  0xa4   :  { %598 = vst [vmem:[#allocation5 + $0x40] sm:$0xff] %v390_v15  ;;  %v301_v34 = vsel %vm300_vm9, %v679_v48, %v297_v39  ;;  %v325_v38 = vmul.f32 0.5, %v324_v61  ;;  %v314_v58 = vmul.f32 %v1063_v46, %v313_v43  ;;  %vm330_vm1 = vmor %vm328_vm14, %vm329_vm12  ;;  %vm319_vm2 = vweird.f32 %v1063_v46 }
  0xa5   :  { %v177_v62 = vpop.xlane.xlu2 %176  ;;  %v175_v49 = vpop.xlane.xlu1 %174  ;;  %v389_v41 = vmul.f32 %v301_v34, %v858_v13  ;;  %v336_v6 = vsub.f32 1.5, %v335_v12  ;;  %v287_v31 = vmul.f32 %v1034_v23, %v286_v22  ;;  %vm368_vm3 = vweird.f32 %v1037_v7  ;;  %vm320_vm5 = vmor %vm318_vm15, %vm319_vm2 }
  0xa6   :  { %v1074_v56 = vpop.eup %688  ;;  %v157_v16 = vpop.xlane.xlu0 %156  ;;  %v326_v48 = vsub.f32 1.5, %v325_v38  ;;  %v1092_v0 = vmax.f32 %v177_v62, 1e-16  ;;  %v315_v63 = vmul.f32 0.5, %v314_v58  ;;  %v1124_v12 = vmax.f32 %v175_v49, 1e-16 }
  0xa7   :  { %v363_v8 = vmul.f32 %v1074_v56, %v1037_v7  ;;  %v1083_v60 = vpop.eup %690  ;;  %597 = vst [vmem:[#allocation5 + $0x38] sm:$0xff] %v389_v41  ;;  %v337_v13 = vmul.f32 %v1041_v59, %v336_v6  ;;  %v291_v27 = vsel %vm290_vm13, %v1034_v23, %v287_v31  ;;  %vm369_vm4 = vweird.f32 %v1074_v56 }
  0xa8   :  { %v327_v44 = vmul.f32 %v1045_v1, %v326_v48  ;;  %v388_v21 = vmul.f32 %v291_v27, %v860_v14  ;;  %v353_v23 = vmul.f32 %v1083_v60, %v1039_v28  ;;  %v316_v29 = vsub.f32 1.5, %v315_v63  ;;  %vm370_vm6 = vmor %vm368_vm3, %vm369_vm4 }
  0xa9   :  { %v364_v40 = vmul.f32 %v1074_v56, %v363_v8  ;;  %v341_v17 = vsel %vm340_vm0, %v1041_v59, %v337_v13  ;;  %v1110_v3 = vpop.eup %692  ;;  %694 = vrsqrt.f32 %v1092_v0  ;;  %v1126_v34 = vmax.f32 %v157_v16, 1e-16 }
  0xaa   :  { %v393_v2 = vmul.f32 %v341_v17, %v868_v18  ;;  %v331_v26 = vsel %vm330_vm1, %v1045_v1, %v327_v44  ;;  %596 = vst [vmem:[#allocation5 + $0x30] sm:$0xff] %v388_v21  ;;  %v354_v59 = vmul.f32 %v1083_v60, %v353_v23  ;;  %v317_v39 = vmul.f32 %v1063_v46, %v316_v29 }
  0xab   :  { %v365_v15 = vmul.f32 0.5, %v364_v40  ;;  %v392_v14 = vmul.f32 %v331_v26, %v870_v19  ;;  %v343_v18 = vmul.f32 %v1110_v3, %v1070_v47  ;;  %vm359_vm7 = vweird.f32 %v1083_v60 }
  0xac   :  { %601 = vst [vmem:[#allocation5 + $0x58] sm:$0xff] %v393_v2  ;;  %v355_v19 = vmul.f32 0.5, %v354_v59  ;;  %v321_v38 = vsel %vm320_vm5, %v1063_v46, %v317_v39  ;;  %696 = vrsqrt.f32 %v1124_v12  ;;  %vm358_vm8 = vweird.f32 %v1039_v28 }
  0xad   :  { %v366_v45 = vsub.f32 1.5, %v365_v15  ;;  %v183_v1 = vpop.xlane.xlu2 %182  ;;  %v181_v61 = vpop.xlane.xlu1 %180  ;;  %600 = vst [vmem:[#allocation5 + $0x50] sm:$0xff] %v392_v14  ;;  %v344_v62 = vmul.f32 %v1110_v3, %v343_v18  ;;  %v391_v6 = vmul.f32 %v321_v38, %v872_v20  ;;  %698 = vrsqrt.f32 %v1126_v34  ;;  %vm360_vm9 = vmor %vm358_vm8, %vm359_vm7 }
  0xae   :  { %v179_v22 = vpop.xlane.xlu0 %178  ;;  %v1131_v41 = vmax.f32 %v183_v1, 1e-16  ;;  %v356_v57 = vsub.f32 1.5, %v355_v19  ;;  %vm349_vm10 = vweird.f32 %v1110_v3  ;;  %v1151_v48 = vmax.f32 %v181_v61, 1e-16 }
  0xaf   :  { %v367_v43 = vmul.f32 %v1074_v56, %v366_v45  ;;  %v345_v49 = vmul.f32 0.5, %v344_v62  ;;  %v1142_v16 = vpop.eup %694  ;;  %599 = vst [vmem:[#allocation5 + $0x48] sm:$0xff] %v391_v6  ;;  %vm348_vm11 = vweird.f32 %v1070_v47  ;;  %vm430_vm13 = vweird.f32 %v1092_v0 }
  0xb0   :  { %v357_v31 = vmul.f32 %v1083_v60, %v356_v57  ;;  %700 = vrsqrt.f32 %v1131_v41  ;;  %vm350_vm12 = vmor %vm348_vm11, %vm349_vm10  ;;  %vm420_vm14 = vweird.f32 %v1124_v12  ;;  %vm378_vm15 = vweird.f32 %v1126_v34 }
  0xb1   :  { %v371_v46 = vsel %vm370_vm6, %v1074_v56, %v367_v43  ;;  %v346_v7 = vsub.f32 1.5, %v345_v49  ;;  %v425_v56 = vmul.f32 %v1142_v16, %v1092_v0  ;;  %702 = vrsqrt.f32 %v1151_v48 }
  0xb2   :  { %v396_v20 = vmul.f32 %v371_v46, %v880_v24  ;;  %v361_v58 = vsel %vm360_vm9, %v1083_v60, %v357_v31  ;;  %v1155_v24 = vmax.f32 %v179_v22, 1e-16  ;;  %v1161_v63 = vpop.eup %696  ;;  %vm431_vm0 = vweird.f32 %v1142_v16 }
  0xb3   :  { %v395_v28 = vmul.f32 %v361_v58, %v882_v25  ;;  %v347_v8 = vmul.f32 %v1110_v3, %v346_v7  ;;  %v426_v13 = vmul.f32 %v1142_v16, %v425_v56  ;;  %v1167_v40 = vpop.eup %698  ;;  %v415_v17 = vmul.f32 %v1161_v63, %v1124_v12  ;;  %vm432_vm4 = vmor %vm430_vm13, %vm431_vm0 }
  0xb4   :  { %604 = vst [vmem:[#allocation5 + $0x70] sm:$0xff] %v396_v20  ;;  %704 = vrsqrt.f32 %v1155_v24  ;;  %v373_v26 = vmul.f32 %v1167_v40, %v1126_v34  ;;  %vm421_vm1 = vweird.f32 %v1161_v63  ;;  %vm460_vm2 = vweird.f32 %v1131_v41 }
  0xb5   :  { %v189_v27 = vpop.xlane.xlu2 %188  ;;  %v187_v44 = vpop.xlane.xlu1 %186  ;;  %603 = vst [vmem:[#allocation5 + $0x68] sm:$0xff] %v395_v28  ;;  %v351_v25 = vsel %vm350_vm12, %v1110_v3, %v347_v8  ;;  %v427_v21 = vmul.f32 0.5, %v426_v13  ;;  %v416_v15 = vmul.f32 %v1161_v63, %v415_v17  ;;  %vm379_vm3 = vweird.f32 %v1167_v40  ;;  %vm422_vm8 = vmor %vm420_vm14, %vm421_vm1 }
  0xb6   :  { %v1165_v47 = vmax.f32 %v189_v27, 1e-16  ;;  %v185_v60 = vpop.xlane.xlu0 %184  ;;  %v1173_v23 = vpop.eup %700  ;;  %v394_v2 = vmul.f32 %v351_v25, %v884_v30  ;;  %v374_v30 = vmul.f32 %v1167_v40, %v373_v26  ;;  %v1187_v14 = vmax.f32 %v187_v44, 1e-16  ;;  %vm380_vm11 = vmor %vm378_vm15, %vm379_vm3 }
  0xb7   :  { %v428_v29 = vsub.f32 1.5, %v427_v21  ;;  %v455_v3 = vmul.f32 %v1173_v23, %v1131_v41  ;;  %v1189_v59 = vpop.eup %702  ;;  %v417_v45 = vmul.f32 0.5, %v416_v15  ;;  %vm461_vm5 = vweird.f32 %v1173_v23 }
  0xb8   :  { %706 = vrsqrt.f32 %v1165_v47  ;;  %602 = vst [vmem:[#allocation5 + $0x60] sm:$0xff] %v394_v2  ;;  %v375_v61 = vmul.f32 0.5, %v374_v30  ;;  %v445_v19 = vmul.f32 %v1189_v59, %v1151_v48  ;;  %vm450_vm6 = vweird.f32 %v1151_v48  ;;  %vm462_vm12 = vmor %vm460_vm2, %vm461_vm5 }
  0xb9   :  { %v429_v39 = vmul.f32 %v1142_v16, %v428_v29  ;;  %v456_v18 = vmul.f32 %v1173_v23, %v455_v3  ;;  %708 = vrsqrt.f32 %v1187_v14  ;;  %v418_v38 = vsub.f32 1.5, %v417_v45 }
  0xba   :  { %v1194_v1 = vpop.eup %704  ;;  %vm440_vm7 = vweird.f32 %v1155_v24  ;;  %v376_v46 = vsub.f32 1.5, %v375_v61  ;;  %v446_v49 = vmul.f32 %v1189_v59, %v445_v19  ;;  %v1211_v20 = vmax.f32 %v185_v60, 1e-16 }
  0xbb   :  { %v433_v22 = vsel %vm432_vm4, %v1142_v16, %v429_v39  ;;  %v457_v43 = vmul.f32 0.5, %v456_v18  ;;  %v435_v62 = vmul.f32 %v1194_v1, %v1155_v24  ;;  %v419_v16 = vmul.f32 %v1161_v63, %v418_v38 }
  0xbc   :  { %v575_v57 = vmul.f32 %v433_v22, %v892_v36  ;;  %v377_v36 = vmul.f32 %v1167_v40, %v376_v46  ;;  %v447_v8 = vmul.f32 0.5, %v446_v49  ;;  %vm451_vm9 = vweird.f32 %v1189_v59 }
  0xbd   :  { %v193_v0 = vpop.xlane.xlu1 %192  ;;  %v195_v31 = vpop.xlane.xlu2 %194  ;;  %v458_v56 = vsub.f32 1.5, %v457_v43  ;;  %v436_v58 = vmul.f32 %v1194_v1, %v435_v62  ;;  %vm441_vm10 = vweird.f32 %v1194_v1  ;;  %v423_v13 = vsel %vm422_vm8, %v1161_v63, %v419_v16  ;;  %vm452_vm14 = vmor %vm450_vm6, %vm451_vm9 }
  0xbe   :  { %v1207_v6 = vpop.eup %706  ;;  %v191_v7 = vpop.xlane.xlu0 %190  ;;  %607 = vst [vmem:[#allocation6 + $0x8] sm:$0xff] %v575_v57  ;;  %v574_v63 = vmul.f32 %v423_v13, %v894_v37  ;;  %v381_v34 = vsel %vm380_vm11, %v1167_v40, %v377_v36  ;;  %v448_v25 = vsub.f32 1.5, %v447_v8  ;;  %710 = vrsqrt.f32 %v1211_v20  ;;  %vm442_vm0 = vmor %vm440_vm7, %vm441_vm10 }
  0xbf   :  { %v485_v28 = vmul.f32 %v1207_v6, %v1165_v47  ;;  %v459_v27 = vmul.f32 %v1173_v23, %v458_v56  ;;  %v437_v44 = vmul.f32 0.5, %v436_v58  ;;  %v1236_v60 = vpop.eup %708  ;;  %v397_v21 = vmul.f32 %v381_v34, %v896_v42 }
  0xc0   :  { %606 = vst [vmem:[#allocation6] sm:$0xff] %v574_v63  ;;  %v449_v37 = vmul.f32 %v1189_v59, %v448_v25  ;;  %vm490_vm13 = vweird.f32 %v1165_v47  ;;  %v475_v41 = vmul.f32 %v1236_v60, %v1187_v14  ;;  %vm491_vm15 = vweird.f32 %v1207_v6 }
  0xc1   :  { %v486_v12 = vmul.f32 %v1207_v6, %v485_v28  ;;  %v463_v17 = vsel %vm462_vm12, %v1173_v23, %v459_v27  ;;  %v438_v2 = vsub.f32 1.5, %v437_v44  ;;  %605 = vst [vmem:[#allocation5 + $0x78] sm:$0xff] %v397_v21  ;;  %v1267_v48 = vmax.f32 %v193_v0, 1e-16  ;;  %vm492_vm1 = vmor %vm490_vm13, %vm491_vm15 }
  0xc2   :  { %v578_v29 = vmul.f32 %v463_v17, %v904_v51  ;;  %v1259_v51 = vmax.f32 %v195_v31, 1e-16  ;;  %v453_v15 = vsel %vm452_vm14, %v1189_v59, %v449_v37  ;;  %v476_v3 = vmul.f32 %v1236_v60, %v475_v41  ;;  %634 = dma.vmem_to_hbm [thread:$0]  %s627_s16, 2048, %s629_s19, [#allocation4], %s807_s14, %s807_s14, %s808_s15  }
  0xc3   :  { %v487_v26 = vmul.f32 0.5, %v486_v12  ;;  %v439_v42 = vmul.f32 %v1194_v1, %v438_v2  ;;  %v1269_v30 = vmax.f32 %v191_v7, 1e-16  ;;  %v577_v45 = vmul.f32 %v453_v15, %v906_v52 }
  0xc4   :  { %610 = vst [vmem:[#allocation6 + $0x20] sm:$0xff] %v578_v29  ;;  %712 = vrsqrt.f32 %v1259_v51  ;;  %v711_v24 = vpop.eup %710  ;;  %v477_v19 = vmul.f32 0.5, %v476_v3  ;;  %vm481_vm2 = vweird.f32 %v1236_v60  ;;  %vm480_vm3 = vweird.f32 %v1187_v14 }
  0xc5   :  { %v488_v40 = vsub.f32 1.5, %v487_v26  ;;  %v199_v23 = vpop.xlane.xlu1 %198  ;;  %v443_v18 = vsel %vm442_vm0, %v1194_v1, %v439_v42  ;;  %714 = vrsqrt.f32 %v1267_v48  ;;  %v201_v52 = vpop.xlane.xlu2 %200  ;;  %609 = vst [vmem:[#allocation6 + $0x18] sm:$0xff] %v577_v45  ;;  %v465_v22 = vmul.f32 %v711_v24, %v1211_v20  ;;  %vm482_vm4 = vmor %vm480_vm3, %vm481_vm2 }
  0xc6   :  { %v197_v39 = vpop.xlane.xlu0 %196  ;;  %v576_v59 = vmul.f32 %v443_v18, %v908_v54  ;;  %v478_v43 = vsub.f32 1.5, %v477_v19  ;;  %716 = vrsqrt.f32 %v1269_v30  ;;  %v1289_v47 = vmax.f32 %v201_v52, 1e-16 }
  0xc7   :  { %v489_v61 = vmul.f32 %v1207_v6, %v488_v40  ;;  %v466_v54 = vmul.f32 %v711_v24, %v465_v22  ;;  %v1291_v62 = vmax.f32 %v199_v23, 1e-16  ;;  %vm471_vm5 = vweird.f32 %v711_v24 }
  0xc8   :  { %608 = vst [vmem:[#allocation6 + $0x10] sm:$0xff] %v576_v59  ;;  %v479_v0 = vmul.f32 %v1236_v60, %v478_v43  ;;  %718 = vrsqrt.f32 %v1289_v47  ;;  %vm470_vm6 = vweird.f32 %v1211_v20  ;;  %vm520_vm7 = vweird.f32 %v1259_v51 }
  0xc9   :  { %v493_v1 = vsel %vm492_vm1, %v1207_v6, %v489_v61  ;;  %v1295_v6 = vmax.f32 %v197_v39, 1e-16  ;;  %720 = vrsqrt.f32 %v1291_v62  ;;  %vm472_vm8 = vmor %vm470_vm6, %vm471_vm5  ;;  %vm510_vm9 = vweird.f32 %v1267_v48 }
  0xca   :  { %v581_v38 = vmul.f32 %v493_v1, %v916_v5  ;;  %v713_v57 = vpop.eup %712  ;;  %v467_v5 = vmul.f32 0.5, %v466_v54  ;;  %v483_v31 = vsel %vm482_vm4, %v1236_v60, %v479_v0  ;;  %vm500_vm10 = vweird.f32 %v1269_v30 }
  0xcb   :  { %v715_v49 = vpop.eup %714  ;;  %v515_v7 = vmul.f32 %v713_v57, %v1259_v51  ;;  %v580_v16 = vmul.f32 %v483_v31, %v918_v9  ;;  %722 = vrsqrt.f32 %v1295_v6  ;;  %vm521_vm11 = vweird.f32 %v713_v57 }
  0xcc   :  { %613 = vst [vmem:[#allocation6 + $0x38] sm:$0xff] %v581_v38  ;;  %v468_v56 = vsub.f32 1.5, %v467_v5  ;;  %v505_v14 = vmul.f32 %v715_v49, %v1267_v48  ;;  %v717_v28 = vpop.eup %716  ;;  %vm511_vm12 = vweird.f32 %v715_v49  ;;  %vm522_vm14 = vmor %vm520_vm7, %vm521_vm11  ;;  %vm550_vm0 = vweird.f32 %v1289_v47 }
  0xcd   :  { %v205_v46 = vpop.xlane.xlu1 %204  ;;  %v516_v36 = vmul.f32 %v713_v57, %v515_v7  ;;  %612 = vst [vmem:[#allocation6 + $0x30] sm:$0xff] %v580_v16  ;;  %v495_v9 = vmul.f32 %v717_v28, %v1269_v30  ;;  %vm501_vm13 = vweird.f32 %v717_v28  ;;  %vm512_vm15 = vmor %vm510_vm9, %vm511_vm12  ;;  %vm540_vm5 = vweird.f32 %v1291_v62 }
  0xce   :  { %v203_v58 = vpop.xlane.xlu0 %202  ;;  %v1305_v8 = vmax.f32 %v205_v46, 1e-16  ;;  %v469_v13 = vmul.f32 %v711_v24, %v468_v56  ;;  %v506_v27 = vmul.f32 %v715_v49, %v505_v14  ;;  %v719_v20 = vpop.eup %718  ;;  %vm502_vm2 = vmor %vm500_vm10, %vm501_vm13 }
  0xcf   :  { %v517_v44 = vmul.f32 0.5, %v516_v36  ;;  %v1311_v12 = vmax.f32 %v203_v58, 1e-16  ;;  %v496_v34 = vmul.f32 %v717_v28, %v495_v9  ;;  %v721_v25 = vpop.eup %720  ;;  %v545_v2 = vmul.f32 %v719_v20, %v1289_v47 }
  0xd0   :  { %724 = vrsqrt.f32 %v1305_v8  ;;  %v473_v60 = vsel %vm472_vm8, %v711_v24, %v469_v13  ;;  %v507_v63 = vmul.f32 0.5, %v506_v27  ;;  %v535_v37 = vmul.f32 %v721_v25, %v1291_v62 }
  0xd1   :  { %v579_v21 = vmul.f32 %v473_v60, %v920_v11  ;;  %v518_v17 = vsub.f32 1.5, %v517_v44  ;;  %v497_v29 = vmul.f32 0.5, %v496_v34  ;;  %v723_v41 = vpop.eup %722  ;;  %v546_v40 = vmul.f32 %v719_v20, %v545_v2 }
  0xd2   :  { %v508_v26 = vsub.f32 1.5, %v507_v63  ;;  %726 = vrsqrt.f32 %v1311_v12  ;;  %v536_v15 = vmul.f32 %v721_v25, %v535_v37  ;;  %v525_v3 = vmul.f32 %v723_v41, %v1295_v6 }
  0xd3   :  { %611 = vst [vmem:[#allocation6 + $0x28] sm:$0xff] %v579_v21  ;;  %v519_v42 = vmul.f32 %v713_v57, %v518_v17  ;;  %v498_v23 = vsub.f32 1.5, %v497_v29  ;;  %v547_v18 = vmul.f32 0.5, %v546_v40  ;;  %vm551_vm1 = vweird.f32 %v719_v20 }
  0xd4   :  { %v509_v11 = vmul.f32 %v715_v49, %v508_v26  ;;  %v537_v59 = vmul.f32 0.5, %v536_v15  ;;  %v526_v1 = vmul.f32 %v723_v41, %v525_v3  ;;  %vm541_vm3 = vweird.f32 %v721_v25  ;;  %vm552_vm4 = vmor %vm550_vm0, %vm551_vm1 }
  0xd5   :  { %v523_v45 = vsel %vm522_vm14, %v713_v57, %v519_v42  ;;  %v499_v51 = vmul.f32 %v717_v28, %v498_v23  ;;  %v548_v52 = vsub.f32 1.5, %v547_v18  ;;  %vm542_vm6 = vmor %vm540_vm5, %vm541_vm3  ;;  %vm531_vm7 = vweird.f32 %v723_v41 }
  0xd6   :  { %v725_v39 = vpop.eup %724  ;;  %v584_v61 = vmul.f32 %v523_v45, %v928_v32  ;;  %v513_v24 = vsel %vm512_vm15, %v715_v49, %v509_v11  ;;  %v538_v38 = vsub.f32 1.5, %v537_v59  ;;  %v527_v0 = vmul.f32 0.5, %v526_v1 }
  0xd7   :  { %v583_v19 = vmul.f32 %v513_v24, %v930_v33  ;;  %v565_v48 = vmul.f32 %v725_v39, %v1305_v8  ;;  %v503_v22 = vsel %vm502_vm2, %v717_v28, %v499_v51  ;;  %v549_v54 = vmul.f32 %v719_v20, %v548_v52 }
  0xd8   :  { %616 = vst [vmem:[#allocation6 + $0x50] sm:$0xff] %v584_v61  ;;  %v727_v43 = vpop.eup %726  ;;  %v582_v32 = vmul.f32 %v503_v22, %v932_v35  ;;  %v539_v33 = vmul.f32 %v721_v25, %v538_v38  ;;  %v528_v46 = vsub.f32 1.5, %v527_v0  ;;  %vm530_vm8 = vweird.f32 %v1295_v6 }
  0xd9   :  { %615 = vst [vmem:[#allocation6 + $0x48] sm:$0xff] %v583_v19  ;;  %v566_v57 = vmul.f32 %v725_v39, %v565_v48  ;;  %v555_v30 = vmul.f32 %v727_v43, %v1311_v12  ;;  %v553_v5 = vsel %vm552_vm4, %v719_v20, %v549_v54  ;;  %vm571_vm9 = vweird.f32 %v725_v39  ;;  %vm532_vm10 = vmor %vm530_vm8, %vm531_vm7 }
  0xda   :  { %614 = vst [vmem:[#allocation6 + $0x40] sm:$0xff] %v582_v32  ;;  %v587_v35 = vmul.f32 %v553_v5, %v940_v50  ;;  %v543_v31 = vsel %vm542_vm6, %v721_v25, %v539_v33  ;;  %v529_v16 = vmul.f32 %v723_v41, %v528_v46  ;;  %vm570_vm11 = vweird.f32 %v1305_v8 }
  0xdb   :  { %v567_v49 = vmul.f32 0.5, %v566_v57  ;;  %v556_v7 = vmul.f32 %v727_v43, %v555_v30  ;;  %v586_v47 = vmul.f32 %v543_v31, %v942_v53  ;;  %vm572_vm12 = vmor %vm570_vm11, %vm571_vm9  ;;  %vm561_vm13 = vweird.f32 %v727_v43 }
  0xdc   :  { %619 = vst [vmem:[#allocation6 + $0x68] sm:$0xff] %v587_v35  ;;  %v533_v14 = vsel %vm532_vm10, %v723_v41, %v529_v16  ;;  %vm560_vm14 = vweird.f32 %v1311_v12 }
  0xdd   :  { %v568_v56 = vsub.f32 1.5, %v567_v49  ;;  %v557_v62 = vmul.f32 0.5, %v556_v7  ;;  %618 = vst [vmem:[#allocation6 + $0x60] sm:$0xff] %v586_v47  ;;  %v585_v28 = vmul.f32 %v533_v14, %v944_v55  ;;  %vm562_vm15 = vmor %vm560_vm14, %vm561_vm13 }
  0xdf   :  { %v569_v58 = vmul.f32 %v725_v39, %v568_v56  ;;  %v558_v50 = vsub.f32 1.5, %v557_v62  ;;  %617 = vst [vmem:[#allocation6 + $0x58] sm:$0xff] %v585_v28 }
  0xe1   :  { %v573_v6 = vsel %vm572_vm12, %v725_v39, %v569_v58  ;;  %v559_v36 = vmul.f32 %v727_v43, %v558_v50 }
  0xe2   :  { %v589_v53 = vmul.f32 %v573_v6, %v952_v4 }
  0xe3   :  { %v563_v8 = vsel %vm562_vm15, %v727_v43, %v559_v36 }
  0xe4   :  { %621 = vst [vmem:[#allocation6 + $0x78] sm:$0xff] %v589_v53  ;;  %v588_v55 = vmul.f32 %v563_v8, %v954_v10 }
  0xe6   :  { %620 = vst [vmem:[#allocation6 + $0x70] sm:$0xff] %v588_v55 }
  0xe7   :  { %647 = dma.vmem_to_hbm [thread:$0]  %s640_s20, 2048, %s642_s23, [#allocation7], %s807_s14, %s807_s14, %s808_s15  }
  0xe8   :  { %802 = dma.done.wait [#allocation4], 2048  }
  0xe9   :  { %803 = vsyncadd [#allocation4], 4294965248 }
  0xea   :  { %804 = dma.done.wait [#allocation7], 2048  }
  0xeb   :  { %805 = vsyncadd [#allocation7], 4294965248 }
  0xec   :  { %656 = vsyncpa [#allocation3], 1 }
  0xed   :  { %657 = vsyncpa [#allocation4], 1 }
  0xee   :  { %658 = vsyncpa [#allocation7], 1 }

</bundles_post_ra>
